<compile_context>
chip_gen: v7x
topology: tpu7x:2x2x1
jax: 0.10.0
libtpu: 0.0.40
codegen_flags: <defaults>
</compile_context>

<pallas_src>
import functools
import math

import jax
import jax.numpy as jnp
from jax.experimental import pallas as pl
from jax.experimental.pallas import tpu as pltpu

_LANES = 128
_SUBLANES = 8
_VREG = _SUBLANES * _LANES  # 1024 elements per (8,128) vreg


def _dice_partial_kernel(x_ref, t_ref, inter_ref, usum_ref, *,
                         tiles_per_par: int, first_masked: int, n_valid: int,
                         tile_vregs: int, needs_mask: bool, threshold):
    i = pl.program_id(0)   # "parallel" axis (one per TensorCore on v7x)
    j = pl.program_id(1)   # "arbitrary" reduction axis

    # Output blocks are the resident accumulators for this parallel index.
    @pl.when(j == 0)
    def _():
        inter_ref[...] = jnp.zeros_like(inter_ref)
        usum_ref[...] = jnp.zeros_like(usum_ref)

    x = x_ref[...].astype(jnp.float32)   # (tile_vregs, 8, 128)
    t = t_ref[...].astype(jnp.float32)

    if threshold is not None:
        # sigmoid is strictly monotone: sigmoid(x) > thr  <=>  x > logit(thr).
        logit_thr = math.log(threshold / (1.0 - threshold))
        p = (x > jnp.float32(logit_thr)).astype(jnp.float32)
    else:
        # sigmoid(x) = 0.5*(1 + tanh(x/2)): a single EUP op per element.
        p = 0.5 * (1.0 + jnp.tanh(0.5 * x))

    g = i * tiles_per_par + j            # un-clamped global tile index

    def accumulate(mask_elems: bool):
        pv, tv = p, t
        if mask_elems:
            r = jax.lax.broadcasted_iota(jnp.int32, p.shape, 0)
            s = jax.lax.broadcasted_iota(jnp.int32, p.shape, 1)
            l = jax.lax.broadcasted_iota(jnp.int32, p.shape, 2)
            flat = ((g * tile_vregs + r) * _SUBLANES + s) * _LANES + l
            valid = flat < n_valid
            pv = jnp.where(valid, pv, 0.0)
            tv = jnp.where(valid, tv, 0.0)
        # Full-vreg (1,8,128) accumulators: per-step work is vreg-wise VPU adds
        # over the tile's leading axis; the XLU lane/sublane reduce happens
        # exactly once, in the wrapper combine.
        inter_ref[...] += jnp.sum(tv * pv, axis=0, keepdims=True)
        usum_ref[...] += jnp.sum(tv + pv, axis=0, keepdims=True)

    if needs_mask:
        # Only the overhanging tile(s) at the very end can contain invalid
        # (out-of-range / duplicated) elements; keep the steady state lean.
        is_edge = g >= first_masked

        @pl.when(is_edge)
        def _():
            accumulate(True)

        @pl.when(jnp.logical_not(is_edge))
        def _():
            accumulate(False)
    else:
        accumulate(False)


def dice_loss(logits, targets, *, eps: float = 1e-07, threshold=None,
              soften: float = 0.0, tile_rows: int = 8192, num_parallel: int = 2):
    """Pallas TPU implementation of DiceLoss.forward (returns a scalar)."""
    assert logits.shape == targets.shape
    if threshold is not None:
        assert 0.0 < threshold < 1.0, "threshold must lie strictly in (0, 1)"

    n = int(logits.size)
    x_flat = logits.reshape(-1)            # native dtype (bf16 stays bf16)
    t_flat = targets.reshape(-1)

    n_bulk = (n // _VREG) * _VREG          # whole (8,128) vregs -> kernel
    R = n_bulk // _VREG

    intersection = jnp.float32(0.0)
    union = jnp.float32(0.0)

    if R > 0:
        if n_bulk == n:
            x_b, t_b = x_flat, t_flat      # zero-copy reshape below
        else:
            x_b = jax.lax.slice(x_flat, (0,), (n_bulk,))
            t_b = jax.lax.slice(t_flat, (0,), (n_bulk,))
        x3d = x_b.reshape(R, _SUBLANES, _LANES)
        t3d = t_b.reshape(R, _SUBLANES, _LANES)

        # Tile size in vregs (tile_rows is in rows of 128 lanes).
        tb = max(1, min(int(tile_rows) // _SUBLANES, R))
        if num_parallel > 1:
            tb = max(1, min(tb, pl.cdiv(R, num_parallel)))
        num_tiles = pl.cdiv(R, tb)                       # genuine tiles
        n_par = max(1, min(num_parallel, num_tiles))     # parallel (core) axis
        tiles_per_par = pl.cdiv(num_tiles, n_par)

        tile_elems = tb * _VREG
        coverage = n_par * tiles_per_par * tile_elems
        needs_mask = coverage != n_bulk
        first_masked = n_bulk // tile_elems
        over_covered = (n_par * tiles_per_par) != num_tiles

        if over_covered:
            # Duplicate trailing step(s) re-read the last genuine tile; their
            # contribution is fully masked out in-kernel.
            def idx_map(i, j):
                return (jnp.minimum(i * tiles_per_par + j, num_tiles - 1), 0, 0)
        else:
            def idx_map(i, j):
                return (i * tiles_per_par + j, 0, 0)

        kernel = functools.partial(
            _dice_partial_kernel,
            tiles_per_par=tiles_per_par,
            first_masked=first_masked,
            n_valid=n_bulk,
            tile_vregs=tb,
            needs_mask=needs_mask,
            threshold=threshold)

        # 2 inputs x 2 pipeline buffers + headroom; keeps v5e's 16 MiB default
        # from rejecting the default 8192-row (4 MiB/input) f32 blocks.
        block_bytes = tile_elems * (x3d.dtype.itemsize + t3d.dtype.itemsize)
        vmem_limit = int(min(128 << 20, max(16 << 20, 2 * block_bytes + (4 << 20))))

        inter_p, usum_p = pl.pallas_call(
            kernel,
            out_shape=(
                jax.ShapeDtypeStruct((n_par, _SUBLANES, _LANES), jnp.float32),
                jax.ShapeDtypeStruct((n_par, _SUBLANES, _LANES), jnp.float32),
            ),
            grid_spec=pltpu.PrefetchScalarGridSpec(
                num_scalar_prefetch=0,
                grid=(n_par, tiles_per_par),
                in_specs=[
                    pl.BlockSpec((tb, _SUBLANES, _LANES), idx_map),
                    pl.BlockSpec((tb, _SUBLANES, _LANES), idx_map),
                ],
                out_specs=[
                    pl.BlockSpec((1, _SUBLANES, _LANES), lambda i, j: (i, 0, 0)),
                    pl.BlockSpec((1, _SUBLANES, _LANES), lambda i, j: (i, 0, 0)),
                ],
            ),
            compiler_params=pltpu.CompilerParams(
                dimension_semantics=("parallel", "arbitrary"),
                vmem_limit_bytes=vmem_limit),
        )(x3d, t3d)

        # Tiny cross-core / cross-vreg combine (2 * n_par * 1024 floats).
        intersection = intersection + jnp.sum(inter_p)
        union = union + jnp.sum(usum_p)

    if n_bulk != n:
        # Plain-JAX epilogue for the < 1024-element remainder.
        xt = x_flat[n_bulk:].astype(jnp.float32)
        tt = t_flat[n_bulk:].astype(jnp.float32)
        pt = jax.nn.sigmoid(xt)
        if threshold is not None:
            pt = (pt > threshold).astype(jnp.float32)
        intersection = intersection + jnp.sum(tt * pt)
        union = union + jnp.sum(tt) + jnp.sum(pt)

    d = (2.0 * intersection + soften) / (union + eps + soften)
    return (1.0 - d).astype(jnp.float32)


def dice_loss_ref(logits, targets, eps=1e-07, threshold=None, soften=0.0):
    p = jax.nn.sigmoid(logits.astype(jnp.float32))
    if threshold is not None:
        p = (p > threshold).astype(jnp.float32)
    t = targets.astype(jnp.float32)
    intersection = jnp.sum(t * p)
    union = jnp.sum(t) + jnp.sum(p)
    d = (2.0 * intersection + soften) / (union + eps + soften)
    return 1.0 - d


if __name__ == "__main__":
    key = jax.random.PRNGKey(0)
    k1, k2, k3, k4, k5, k6 = jax.random.split(key, 6)

    # NCHW, same convention as the PyTorch module.
    logits = jax.random.normal(k1, (2, 4, 16, 16), dtype=jnp.float32)
    targets = (jax.random.uniform(k2, (2, 4, 16, 16)) > 0.5).astype(jnp.float32)

    loss = jax.block_until_ready(dice_loss(logits, targets))
    ref = dice_loss_ref(logits, targets)
    assert jnp.allclose(loss, ref, atol=1e-4, rtol=1e-4), (loss, ref)

    # Thresholded path (hard mask via logit comparison).
    loss_t = jax.block_until_ready(dice_loss(logits, targets, threshold=0.5))
    ref_t = dice_loss_ref(logits, targets, threshold=0.5)
    assert jnp.allclose(loss_t, ref_t, atol=1e-4, rtol=1e-4), (loss_t, ref_t)

    # Ragged grid (odd tile count + duplicate clamped step) with tiny tiles.
    lg3 = jax.random.normal(k3, (3, 4, 16, 16), dtype=jnp.float32)
    tg3 = (jax.random.uniform(k4, (3, 4, 16, 16)) > 0.5).astype(jnp.float32)
    loss3 = jax.block_until_ready(dice_loss(lg3, tg3, tile_rows=8))
    ref3 = dice_loss_ref(lg3, tg3)
    assert jnp.allclose(loss3, ref3, atol=1e-4, rtol=1e-4), (loss3, ref3)

    # Size not divisible by 1024: kernel bulk + plain-JAX tail epilogue.
    lg4 = jax.random.normal(k5, (2, 4, 16, 18), dtype=jnp.float32)
    tg4 = (jax.random.uniform(k6, (2, 4, 16, 18)) > 0.5).astype(jnp.float32)
    loss4 = jax.block_until_ready(dice_loss(lg4, tg4))
    ref4 = dice_loss_ref(lg4, tg4)
    assert jnp.allclose(loss4, ref4, atol=1e-4, rtol=1e-4), (loss4, ref4)

    print("KERNEL_OK")
</pallas_src>

<mosaic_0001>
module attributes {stable_mosaic.version = 11 : i64} {
  func.func @_dice_partial_kernel(%arg0: i32, %arg1: i32, %arg2: memref<1x8x128xf32, #tpu.memory_space<vmem>>, %arg3: memref<1x8x128xf32, #tpu.memory_space<vmem>>, %arg4: memref<1x8x128xf32, #tpu.memory_space<vmem>>, %arg5: memref<1x8x128xf32, #tpu.memory_space<vmem>>) attributes {dimension_semantics = [#tpu.dimension_semantics<parallel>, #tpu.dimension_semantics<arbitrary>], iteration_bounds = array<i64: 2, 1>, scalar_prefetch = 0 : i64, scratch_operands = 0 : i64, tpu.core_type = #tpu.core_type<tc>, window_params = [{transform_indices = @transform_0, window_bounds = array<i64: 1, 8, 128>}, {transform_indices = @transform_1, window_bounds = array<i64: 1, 8, 128>}, {transform_indices = @transform_2, window_bounds = array<i64: 1, 8, 128>}, {transform_indices = @transform_3, window_bounds = array<i64: 1, 8, 128>}]} {
    %c0_i32 = arith.constant 0 : i32
    %0 = arith.cmpi eq, %arg1, %c0_i32 : i32
    %1 = arith.extui %0 : i1 to i32
    %c0_i32_0 = arith.constant 0 : i32
    %2 = arith.cmpi ne, %1, %c0_i32_0 : i32
    scf.if %2 {
      %cst_22 = arith.constant 0.000000e+00 : f32
      %24 = vector.broadcast %cst_22 : f32 to vector<1x8x128xf32>
      %c0_23 = arith.constant 0 : index
      %c0_24 = arith.constant 0 : index
      %c0_25 = arith.constant 0 : index
      %25 = vector.load %arg4[%c0_23, %c0_24, %c0_25] : memref<1x8x128xf32, #tpu.memory_space<vmem>>, vector<1x8x128xf32>
      tpu.vector_store %arg4[%c0_23, %c0_24, %c0_25], %24 {strides = array<i32>} : memref<1x8x128xf32, #tpu.memory_space<vmem>>, vector<1x8x128xf32>,
      %cst_26 = arith.constant 0.000000e+00 : f32
      %26 = vector.broadcast %cst_26 : f32 to vector<1x8x128xf32>
      %c0_27 = arith.constant 0 : index
      %c0_28 = arith.constant 0 : index
      %c0_29 = arith.constant 0 : index
      %27 = vector.load %arg5[%c0_27, %c0_28, %c0_29] : memref<1x8x128xf32, #tpu.memory_space<vmem>>, vector<1x8x128xf32>
      tpu.vector_store %arg5[%c0_27, %c0_28, %c0_29], %26 {strides = array<i32>} : memref<1x8x128xf32, #tpu.memory_space<vmem>>, vector<1x8x128xf32>,
    } else {
    }
    %c0 = arith.constant 0 : index
    %c0_1 = arith.constant 0 : index
    %c0_2 = arith.constant 0 : index
    %3 = vector.load %arg2[%c0, %c0_1, %c0_2] : memref<1x8x128xf32, #tpu.memory_space<vmem>>, vector<1x8x128xf32>
    %c0_3 = arith.constant 0 : index
    %c0_4 = arith.constant 0 : index
    %c0_5 = arith.constant 0 : index
    %4 = vector.load %arg3[%c0_3, %c0_4, %c0_5] : memref<1x8x128xf32, #tpu.memory_space<vmem>>, vector<1x8x128xf32>
    %cst = arith.constant 5.000000e-01 : f32
    %5 = vector.broadcast %cst : f32 to vector<1x8x128xf32>
    %6 = arith.mulf %5, %3 : vector<1x8x128xf32>
    %7 = math.tanh %6 : vector<1x8x128xf32>
    %cst_6 = arith.constant 1.000000e+00 : f32
    %8 = vector.broadcast %cst_6 : f32 to vector<1x8x128xf32>
    %9 = arith.addf %8, %7 : vector<1x8x128xf32>
    %cst_7 = arith.constant 5.000000e-01 : f32
    %10 = vector.broadcast %cst_7 : f32 to vector<1x8x128xf32>
    %11 = arith.mulf %10, %9 : vector<1x8x128xf32>
    %c0_8 = arith.constant 0 : index
    %c0_9 = arith.constant 0 : index
    %c0_10 = arith.constant 0 : index
    %12 = vector.load %arg4[%c0_8, %c0_9, %c0_10] : memref<1x8x128xf32, #tpu.memory_space<vmem>>, vector<1x8x128xf32>
    %13 = arith.mulf %4, %11 : vector<1x8x128xf32>
    %cst_11 = arith.constant dense<0.000000e+00> : vector<8x128xf32>
    %14 = vector.multi_reduction <add>, %13, %cst_11 [0] : vector<1x8x128xf32> to vector<8x128xf32>
    %15 = vector.shape_cast %14 : vector<8x128xf32> to vector<1x8x128xf32>
    %16 = arith.addf %12, %15 : vector<1x8x128xf32>
    %c0_12 = arith.constant 0 : index
    %c0_13 = arith.constant 0 : index
    %c0_14 = arith.constant 0 : index
    %17 = vector.load %arg4[%c0_12, %c0_13, %c0_14] : memref<1x8x128xf32, #tpu.memory_space<vmem>>, vector<1x8x128xf32>
    tpu.vector_store %arg4[%c0_12, %c0_13, %c0_14], %16 {strides = array<i32>} : memref<1x8x128xf32, #tpu.memory_space<vmem>>, vector<1x8x128xf32>,
    %c0_15 = arith.constant 0 : index
    %c0_16 = arith.constant 0 : index
    %c0_17 = arith.constant 0 : index
    %18 = vector.load %arg5[%c0_15, %c0_16, %c0_17] : memref<1x8x128xf32, #tpu.memory_space<vmem>>, vector<1x8x128xf32>
    %19 = arith.addf %4, %11 : vector<1x8x128xf32>
    %cst_18 = arith.constant dense<0.000000e+00> : vector<8x128xf32>
    %20 = vector.multi_reduction <add>, %19, %cst_18 [0] : vector<1x8x128xf32> to vector<8x128xf32>
    %21 = vector.shape_cast %20 : vector<8x128xf32> to vector<1x8x128xf32>
    %22 = arith.addf %18, %21 : vector<1x8x128xf32>
    %c0_19 = arith.constant 0 : index
    %c0_20 = arith.constant 0 : index
    %c0_21 = arith.constant 0 : index
    %23 = vector.load %arg5[%c0_19, %c0_20, %c0_21] : memref<1x8x128xf32, #tpu.memory_space<vmem>>, vector<1x8x128xf32>
    tpu.vector_store %arg5[%c0_19, %c0_20, %c0_21], %22 {strides = array<i32>} : memref<1x8x128xf32, #tpu.memory_space<vmem>>, vector<1x8x128xf32>,
    return
  }
  func.func @transform_0(%arg0: i32, %arg1: i32) -> (i32, i32, i32) {
    %c1_i32 = arith.constant 1 : i32
    %0 = arith.muli %arg0, %c1_i32 : i32
    %1 = arith.addi %0, %arg1 : i32
    %c0_i32 = arith.constant 0 : i32
    %c0_i32_0 = arith.constant 0 : i32
    %c0_i32_1 = arith.constant 0 : i32
    return %1, %c0_i32, %c0_i32_0 : i32, i32, i32
  }
  func.func @transform_1(%arg0: i32, %arg1: i32) -> (i32, i32, i32) {
    %c1_i32 = arith.constant 1 : i32
    %0 = arith.muli %arg0, %c1_i32 : i32
    %1 = arith.addi %0, %arg1 : i32
    %c0_i32 = arith.constant 0 : i32
    %c0_i32_0 = arith.constant 0 : i32
    %c0_i32_1 = arith.constant 0 : i32
    return %1, %c0_i32, %c0_i32_0 : i32, i32, i32
  }
  func.func @transform_2(%arg0: i32, %arg1: i32) -> (i32, i32, i32) {
    %c0_i32 = arith.constant 0 : i32
    %c0_i32_0 = arith.constant 0 : i32
    %c0_i32_1 = arith.constant 0 : i32
    return %arg0, %c0_i32, %c0_i32_0 : i32, i32, i32
  }
  func.func @transform_3(%arg0: i32, %arg1: i32) -> (i32, i32, i32) {
    %c0_i32 = arith.constant 0 : i32
    %c0_i32_0 = arith.constant 0 : i32
    %c0_i32_1 = arith.constant 0 : i32
    return %arg0, %c0_i32, %c0_i32_0 : i32, i32, i32
  }
}

</mosaic_0001>

<bundles_post_ra>
// kernel: tpu_custom_call.1
= control target key start
LH: loop header
LB: loop body
LE: loop exit
PB: predicated region body
PF: predicated region fallthrough
CT: control target
= control target key end

     0   :  { %9 = vsyncpa [#allocation3], 0  ;;  %s990_s0 = inlined_call_operand.hbm [shape: f32[2,8,128], index: 0, kind: input, shape index: {}]   ;;  %s991_s1 = inlined_call_operand.hbm [shape: f32[2,8,128], index: 1, kind: input, shape index: {}]   ;;  %s992_s2 = inlined_call_operand.hbm [shape: f32[2,8,128], index: 2, kind: output, shape index: {0}]   ;;  %s993_s3 = inlined_call_operand.hbm [shape: f32[2,8,128], index: 3, kind: output, shape index: {1}]  }
   0x1   :  { %11 = vsyncpa [#allocation3 + $0x1], 0 }
   0x2   :  { %12 = vsyncpa [#allocation6], 0 }
   0x3   :  { %14 = vsyncpa [#allocation6 + $0x1], 0 }
   0x4   :  { %15 = vsyncpa [#allocation4], 0 }
   0x5   :  { %17 = vsyncpa [#allocation4 + $0x1], 0 }
   0x6   :  { %18 = vsyncpa [#allocation9], 0 }
   0x7   :  { %20 = vsyncpa [#allocation9 + $0x1], 0  ;;  %s741_s12 = smov 0   ;;  %s743_s13 = smov 0  }
   0x8   :  { %s745_s14 = smov 0   ;;  %s747_s15 = smov 0  }
   0x9   :  { %s749_s16 = smov 0   ;;  %s751_s17 = smov 0  }
   0xa LB: > { %s443_s18 = sadd.s32 4294967295, %s715_s17   ;;  %s444_s19 = sadd.s32 4294967294, %s715_s17   ;;  %s715_s17 = sphi %s751_s17, %s26_s17   ;;  %s711_s16 = sphi %s749_s16, %s1013_s16   ;;  %s707_s15 = sphi %s747_s15, %s1012_s15   ;;  %s703_s14 = sphi %s745_s14, %s1011_s14   ;;  %s699_s13 = sphi %s743_s13, %s1010_s13   ;;  %s695_s12 = sphi %s741_s12, %s1009_s12  }
   0xb   : > { %s38_s20 = sadd.s32 1, %s711_s16  ;;  %s47_s21 = sadd.s32 1, %s703_s14 }
   0xc   : > { %p40_p0 = scmp.ge.s32.totalorder %s38_s20, 2  ;;  %p54_p1 = scmp.ne.s32.totalorder %s703_s14, %s699_s13 }
   0xd   : > { %p55_p2 = scmp.eq.s32.totalorder %s715_s17, 0  ;;  %p60_p3 = scmp.ne.s32.totalorder %s699_s13, %s695_s12 }
   0xe   : > { %s1015_s20 = smov (%p40_p0, %s38_s20), 0  ;;  %p61_p5 = scmp.eq.s32.totalorder %s443_s18, 0 }
   0xf   : > { %p782_p4 = por %p55_p2, %p54_p1  ;;  %s44_s23 = ssub.s32 %s711_s16, %s1015_s20 }
  0x10   : > { %p112_p6 = scmp.eq.s32.totalorder %s443_s18, 1  ;;  %p45_p7 = scmp.eq.s32.totalorder %s44_s23, 0 }
  0x11   : > { %p788_p8 = por %p61_p5, %p60_p3  ;;  %p118_p10 = scmp.eq.s32.totalorder %s444_s19, 1 }
  0x12   : > { %p792_p9 = por %p112_p6, %p54_p1  ;;  %p484_p13 = scmp.lt.s32.totalorder %s715_s17, 2 }
  0x13   : > { %s997_s24 = scalar_select %p788_p8, 1, 0 }
  0x14   : > { %s998_s25 = scalar_select %p792_p9, 1, 0 }
  0x15   : > { %s797_s26 = scalar_select %p45_p7, %s703_s14, %s47_s21  }
  0x16   : > { %p799_p11 = por %p118_p10, %p60_p3  ;;  %s806_s28 = sand.u32 1, %s703_s14  }
  0x17   : > { %s447_s29 = sshll.u32 %s806_s28, 3  ;;  %s448_s30 = sshll.u32 %s711_s16, 7 }
  0x18   : > { %s999_s27 = scalar_select %p799_p11, 1, 0 }
  0x19   : > { %s815_s6 = scalar_lea.hbm %s990_s0, %s448_s30  ;;  %s168_s7 = scalar_lea.vmem [#allocation2], %s447_s29 }
  0x1a   : > { %s176_s8 = sshll.u32 %s168_s7, 4  ;;  %p823_p0 = pnand %p484_p13, %p782_p4  ;;  %s819_s8 = int_to_ptr.vmem [resolvable:$true] %s176_s8 }
  0x1b   : > { %s165_s10 = scalar_lea.sflag [#allocation3], %s806_s28  ;;  %s537_s11 = scalar_lea.hbm %s815_s6, 128 }
  0x1c   : > { %p538_p3 = scmp.ne.s32.totalorder %s815_s6, %s537_s11  ;;  %p539_p5 = pneg %p823_p0 }
  0x1d   : > { %s542_s21 = scalar_lea.hbm %s990_s0, 256  ;;  %p543_p4 = scmp.lt.u32.totalorder %s815_s6, %s990_s0 }
  0x1e   : > { %p540_p6 = pnand %p539_p5, %p538_p3  ;;  %p544_p10 = scmp.lt.u32.totalorder %s542_s21, %s537_s11 }
  0x1f   : > { %p546_p12 = scmp.lt.u32.totalorder %s537_s11, %s815_s6 }
  0x20   : > { %p541_p7 = pneg %p540_p6  ;;  %p545_p13 = por %p544_p10, %p543_p4 }
  0x22   : > { %p547_p1 = por %p546_p12, %p545_p13 }
  0x24   : > { %p548_p2 = pnand %p547_p1, %p541_p7 }
  0x26   : > { %551 = shalt.err (!%p548_p2)
}
  0x27   : > { %s552_s4 = scalar_lea.vmem %s819_s8, 128  ;;  %s717_s5 = smov [#allocation2]  }
  0x28   : > { %p553_p3 = scmp.ne.s32.totalorder %s819_s8, %s552_s4  ;;  %s557_s7 = sshll.u32 %s717_s5, 4  ;;  %s558_s7 = int_to_ptr.vmem [resolvable:$false] %s557_s7 }
  0x29   : > { %s559_s18 = scalar_lea.vmem %s558_s7, 256  ;;  %p560_p9 = scmp.lt.s32.totalorder %s819_s8, %s558_s7 }
  0x2a   : > { %p555_p6 = pnand %p553_p3, %p539_p5  ;;  %p561_p4 = scmp.lt.s32.totalorder %s559_s18, %s552_s4 }
  0x2c   : > { %p556_p11 = pneg %p555_p6  ;;  %p562_p10 = por %p561_p4, %p560_p9 }
  0x2e   : > { %p563_p12 = pnand %p562_p10, %p556_p11 }
  0x30   : > { %566 = shalt.err (!%p563_p12)
}
  0x31   : > { %473 = dma.hbm_to_vmem [thread:$0]  (!%p823_p0), %s815_s6, 128, %s819_s8, %s165_s10  }
  0x32   : > { %p1001_p1 = scmp.lt.s32.totalorder %s715_s17, 3  ;;  %p1002_p2 = scmp.ge.s32.totalorder %s715_s17, 1 }
  0x33   : > { %s868_s22 = scalar_lea.hbm %s991_s1, %s448_s30  ;;  %s187_s23 = scalar_lea.vmem [#allocation5], %s447_s29 }
  0x34   : > { %p859_p7 = pnand %p1002_p2, %p1001_p1  ;;  %s195_s4 = sshll.u32 %s187_s23, 4  ;;  %s196_s4 = int_to_ptr.vmem [resolvable:$true] %s195_s4 }
  0x35   : > { %s184_s6 = scalar_lea.sflag [#allocation6], %s806_s28  ;;  %s567_s8 = scalar_lea.hbm %s868_s22, 128 }
  0x36   : > { %s1003_s11 = scalar_select %p859_p7, 1, 0 }
  0x37   : > { %p568_p9 = scmp.ne.s32.totalorder %s868_s22, %s567_s8  ;;  %s572_s30 = scalar_lea.hbm %s991_s1, 256 }
  0x38   : > { %p573_p3 = scmp.lt.u32.totalorder %s868_s22, %s991_s1  ;;  %p574_p6 = scmp.lt.u32.totalorder %s572_s30, %s567_s8 }
  0x39   : > { %p570_p11 = pnand %p568_p9, %p539_p5  ;;  %p576_p10 = scmp.lt.u32.totalorder %s567_s8, %s868_s22 }
  0x3a   : > { %p575_p4 = por %p574_p6, %p573_p3 }
  0x3b   : > { %p571_p13 = pneg %p570_p11 }
  0x3c   : > { %p577_p12 = por %p576_p10, %p575_p4 }
  0x3e   : > { %p578_p1 = pnand %p577_p12, %p571_p13 }
  0x40   : > { %581 = shalt.err (!%p578_p1)
}
  0x41   : > { %s582_s28 = scalar_lea.vmem %s196_s4, 128  ;;  %s718_s29 = smov [#allocation5]  }
  0x42   : > { %p583_p2 = scmp.ne.s32.totalorder %s196_s4, %s582_s28  ;;  %s587_s19 = sshll.u32 %s718_s29, 4  ;;  %s588_s19 = int_to_ptr.vmem [resolvable:$false] %s587_s19 }
  0x43   : > { %s589_s21 = scalar_lea.vmem %s588_s19, 256  ;;  %p590_p8 = scmp.lt.s32.totalorder %s196_s4, %s588_s19 }
  0x44   : > { %p585_p9 = pnand %p583_p2, %p539_p5  ;;  %p591_p7 = scmp.lt.s32.totalorder %s589_s21, %s582_s28 }
  0x46   : > { %p586_p11 = pneg %p585_p9  ;;  %p592_p3 = por %p591_p7, %p590_p8 }
  0x48   : > { %p593_p6 = pnand %p592_p3, %p586_p11 }
  0x4a   : > { %596 = shalt.err (!%p593_p6)
}
  0x4b   : > { %476 = dma.hbm_to_vmem [thread:$0]  (!%p823_p0), %s868_s22, 128, %s196_s4, %s184_s6  }
  0x4c   : > { %p1004_p13 = scmp.ne.s32.totalorder %s1003_s11, 0 }
  0x4d   : > { %s895_s23 = sand.u32 (!%p1004_p13), 1, %s699_s13   ;;  %p1005_p5 = scmp.ne.s32.totalorder (!%p1004_p13), %s997_s24, 0 }
  0x4e   : > { %204 = sbr.rel (%p1004_p13) target bundleno = 145 (0x91), region = 28  ;;  %s452_s8 = sshll.u32 (!%p1004_p13), %s895_s23, 3 }
  0x4f   : > { %s207_s10 = scalar_lea.sflag (!%p1004_p13), [#allocation3], %s895_s23  ;;  %s210_s5 = scalar_lea.vmem (!%p1004_p13), [#allocation2], %s452_s8 }
  0x55   : > { %678 = dma.done.wait (%p1005_p5), %s207_s10, 128  }
  0x56   : > { %680 = vsyncadd (%p1005_p5), %s207_s10, 4294967168  ;;  %s216_s9 = scalar_lea.sflag [#allocation6], %s895_s23  ;;  %s219_s22 = scalar_lea.vmem [#allocation5], %s452_s8 }
  0x57   : > { %682 = dma.done.wait (%p1005_p5), %s216_s9, 128  }
  0x58   : > { %684 = vsyncadd (%p1005_p5), %s216_s9, 4294967168  ;;  %v260_v0 = vld [vmem:[%s210_s5] sm:$0xff]  ;;  %v261_v4 = vld [vmem:[%s219_s22] sm:$0xff]  ;;  %s458_s11 = sshll.u32 %s707_s15, 7  ;;  %s244_s4 = scalar_lea.vmem [#allocation7], %s452_s8 }
  0x59   : > { %v262_v1 = vmul.f32 0.5, %v260_v0  ;;  %s295_s6 = sshll.u32 %s244_s4, 4  ;;  %s251_s30 = scalar_lea.vmem [#allocation8], %s452_s8  ;;  %s914_s6 = int_to_ptr.vmem [resolvable:$true] %s295_s6 }
  0x5a   : > { %s308_s7 = sshll.u32 %s251_s30, 4  ;;  %s912_s28 = scalar_lea.hbm %s992_s2, %s458_s11  ;;  %s921_s7 = int_to_ptr.vmem [resolvable:$true] %s308_s7 }
  0x5b   : > { %535 = vtanh.f32 %v262_v1  ;;  %s919_s15 = scalar_lea.hbm %s993_s3, %s458_s11  ;;  %s277_s21 = scalar_lea.sflag [#allocation4], %s895_s23 }
  0x5c   : > { %s597_s8 = scalar_lea.vmem %s914_s6, 128  ;;  %p1006_p0 = scmp.ne.s32.totalorder %s998_s25, 0 }
  0x5d   : > { %p598_p8 = scmp.ne.s32.totalorder %s914_s6, %s597_s8  ;;  %s719_s10 = smov [#allocation7]  }
  0x5e   : > { %s601_s5 = sshll.u32 %s719_s10, 4  ;;  %s602_s5 = int_to_ptr.vmem [resolvable:$false] %s601_s5 }
  0x5f   : > { %p599_p7 = pnand %p598_p8, %p1006_p0  ;;  %s603_s9 = scalar_lea.vmem %s602_s5, 256 }
  0x60   : > { %p604_p10 = scmp.lt.s32.totalorder %s914_s6, %s602_s5  ;;  %p605_p12 = scmp.lt.s32.totalorder %s603_s9, %s597_s8 }
  0x61   : > { %p600_p4 = pneg %p599_p7 }
  0x62   : > { %p606_p1 = por %p605_p12, %p604_p10 }
  0x64   : > { %p607_p2 = pnand %p606_p1, %p600_p4 }
  0x65   : > { %v536_v2 = vpop.eup %535 }
  0x66   : > { %v264_v3 = vadd.f32 1.0, %v536_v2 }
  0x68   : > { %v265_v5 = vmul.f32 0.5, %v264_v3 }
  0x6a   : > { %v267_v6 = vmul.f32 %v265_v5, %v261_v4  ;;  %v272_v7 = vadd.f32 %v265_v5, %v261_v4 }
  0x6c   : > { %270 = vst [vmem:[%s244_s4] sm:$0xff] %v267_v6  ;;  %275 = vst [vmem:[%s251_s30] sm:$0xff] %v272_v7 }
  0x6d   : > { %610 = shalt.err (!%p607_p2)
}
  0x6e   : > { %s611_s22 = scalar_lea.hbm %s912_s28, 128  ;;  %s615_s30 = scalar_lea.hbm %s992_s2, 256 }
  0x6f   : > { %p612_p9 = scmp.ne.s32.totalorder %s912_s28, %s611_s22  ;;  %p616_p6 = scmp.lt.u32.totalorder %s912_s28, %s992_s2 }
  0x70   : > { %p617_p13 = scmp.lt.u32.totalorder %s615_s30, %s611_s22  ;;  %p619_p8 = scmp.lt.u32.totalorder %s611_s22, %s912_s28 }
  0x71   : > { %p613_p11 = pnand %p612_p9, %p1006_p0 }
  0x72   : > { %p618_p5 = por %p617_p13, %p616_p6 }
  0x73   : > { %p614_p3 = pneg %p613_p11 }
  0x74   : > { %p620_p7 = por %p619_p8, %p618_p5 }
  0x76   : > { %p621_p4 = pnand %p620_p7, %p614_p3 }
  0x78   : > { %624 = shalt.err (!%p621_p4)
}
  0x79   : > { %466 = dma.vmem_to_hbm [thread:$0]  (%p1006_p0), %s914_s6, 128, %s912_s28, %s277_s21  }
  0x7a   : > { %s282_s29 = scalar_lea.sflag [#allocation9], %s895_s23  ;;  %s625_s19 = scalar_lea.vmem %s921_s7, 128 }
  0x7b   : > { %p626_p10 = scmp.ne.s32.totalorder %s921_s7, %s625_s19  ;;  %s720_s8 = smov [#allocation8]  }
  0x7c   : > { %s629_s10 = sshll.u32 %s720_s8, 4  ;;  %s630_s10 = int_to_ptr.vmem [resolvable:$false] %s629_s10 }
  0x7d   : > { %p627_p12 = pnand %p626_p10, %p1006_p0  ;;  %s631_s5 = scalar_lea.vmem %s630_s10, 256 }
  0x7e   : > { %p632_p2 = scmp.lt.s32.totalorder %s921_s7, %s630_s10  ;;  %p633_p9 = scmp.lt.s32.totalorder %s631_s5, %s625_s19 }
  0x7f   : > { %p628_p1 = pneg %p627_p12 }
  0x80   : > { %p634_p11 = por %p633_p9, %p632_p2 }
  0x82   : > { %p635_p3 = pnand %p634_p11, %p628_p1 }
  0x84   : > { %638 = shalt.err (!%p635_p3)
}
  0x85   : > { %s639_s23 = scalar_lea.hbm %s919_s15, 128  ;;  %s643_s21 = scalar_lea.hbm %s993_s3, 256 }
  0x86   : > { %p640_p6 = scmp.ne.s32.totalorder %s919_s15, %s639_s23  ;;  %p644_p8 = scmp.lt.u32.totalorder %s919_s15, %s993_s3 }
  0x87   : > { %p645_p7 = scmp.lt.u32.totalorder %s643_s21, %s639_s23  ;;  %p647_p10 = scmp.lt.u32.totalorder %s639_s23, %s919_s15 }
  0x88   : > { %p641_p13 = pnand %p640_p6, %p1006_p0 }
  0x89   : > { %p646_p4 = por %p645_p7, %p644_p8 }
  0x8a   : > { %p642_p5 = pneg %p641_p13 }
  0x8b   : > { %p648_p12 = por %p647_p10, %p646_p4 }
  0x8d   : > { %p649_p1 = pnand %p648_p12, %p642_p5 }
  0x8f   : > { %652 = shalt.err (!%p649_p1)
}
  0x90   : > { %467 = dma.vmem_to_hbm [thread:$0]  (%p1006_p0), %s921_s7, 128, %s919_s15, %s282_s29  }
  0x91 PF: > { %s320_s11 = sand.u32 1, %s695_s12   ;;  %p1007_p2 = scmp.ne.s32.totalorder %s999_s27, 0 }
  0x92   : > { %p1008_p9 = scmp.ge.s32.totalorder %s715_s17, 2  ;;  %s321_s4 = scalar_lea.sflag [#allocation4], %s320_s11 }
  0x94   : > { %p478_p11 = pnand %p1008_p9, %p1007_p2 }
  0x96   : > { %686 = dma.done.wait (!%p478_p11), %s321_s4, 128  }
  0x97   : > { %688 = vsyncadd (!%p478_p11), %s321_s4, 4294967168  ;;  %s330_s30 = scalar_lea.sflag [#allocation9], %s320_s11 }
  0x98   : > { %690 = dma.done.wait (!%p478_p11), %s330_s30, 128  }
  0x99   : > { %692 = vsyncadd (!%p478_p11), %s330_s30, 4294967168  ;;  %s26_s17 = sadd.s32 1, %s715_s17   ;;  %s1009_s12 = smov %s699_s13 }
  0x9a   : > { %p23_p3 = scmp.ge.s32.totalorder %s26_s17, 4   ;;  %s1010_s13 = smov %s703_s14 }
  0x9b   : > { %s1011_s14 = smov %s797_s26  ;;  %s1012_s15 = smov %s711_s16 }
  0x9c   : > { %s1013_s16 = smov %s1015_s20  ;;  %25 = sbr.rel (!%p23_p3) target bundleno = 10 (0xa), region = 107 }
  0xa3   :  { %335 = vsyncpa [#allocation3], 1 }
  0xa4   :  { %337 = vsyncpa [#allocation3 + $0x1], 1 }
  0xa5   :  { %338 = vsyncpa [#allocation6], 1 }
  0xa6   :  { %340 = vsyncpa [#allocation6 + $0x1], 1 }
  0xa7   :  { %341 = vsyncpa [#allocation4], 1 }
  0xa8   :  { %343 = vsyncpa [#allocation4 + $0x1], 1 }
  0xa9   :  { %344 = vsyncpa [#allocation9], 1 }
  0xaa   :  { %346 = vsyncpa [#allocation9 + $0x1], 1 }

</bundles_post_ra>
